<compile_context>
chip_gen: v6e
topology: v6e:2x2x1
jax: 0.10.0
libtpu: 0.0.40
codegen_flags: <defaults>
</compile_context>

<pallas_src>
import jax
import jax.numpy as jnp
from jax.experimental import pallas as pl
from jax.experimental.pallas import tpu as pltpu


# --------------------------------------------------------------------------- #
# Fused 3-layer MLP kernel (one batch tile per grid step)
# --------------------------------------------------------------------------- #
def _mlp_kernel(x_ref, w1_ref, b1_ref, w2_ref, b2_ref, w3t_ref, b3_ref, o_ref):
    # Dropout(0.5) layers are identity at inference (eval-mode forward).
    x = x_ref[...]                                            # (tb, F)   bf16
    h = jnp.dot(x, w1_ref[...], preferred_element_type=jnp.float32)
    h = jnp.maximum(h + b1_ref[...], 0.0)                     # (tb, 384) f32
    h = jnp.dot(h.astype(jnp.bfloat16), w2_ref[...],
                preferred_element_type=jnp.float32)
    h = jnp.maximum(h + b2_ref[...], 0.0)                     # (tb, 192) f32
    # Final 192 -> 1 layer as VPU multiply + XLU lane reduction: produces the
    # (tb, 1) logits directly (no padded MXU matmul, no 128-wide writeback).
    o_ref[...] = (jnp.sum(h * w3t_ref[...], axis=-1, keepdims=True)
                  + b3_ref[...])                              # (tb, 1)   f32


def _round_up(n, m):
    return ((n + m - 1) // m) * m


def _choose_tile(B, block_b):
    """Pick the batch tile size (multiple of 8)."""
    B8 = _round_up(B, 8)
    if B8 <= block_b:
        # Small batch: split into (up to) 2 tiles so a v7x megacore can run one
        # tile per TensorCore; v5e/v6e simply loop over both tiles.
        return max(8, _round_up(pl.cdiv(B8, 2), 8))
    # Large batch: biggest candidate tile that wastes < half a tile on padding
    # (amortizes ~0.35us/step pipeline overhead without running the MLP on
    # large blocks of zero-padded rows).
    cands = [c for c in (1024, 512, 256, 128) if c <= block_b]
    for c in cands:
        if _round_up(B, c) - B < c // 2:
            return c
    return min(cands, key=lambda c: (_round_up(B, c) - B, -c))


def prepare_params(params):
    """One-time conversion to kernel layout: bf16 weights (f32 accumulation on
    the MXU), f32 biases, and the final weight transposed to (1, 192)."""
    return {
        "w1": params["w1"].astype(jnp.bfloat16),   # (768, 384)
        "b1": params["b1"].astype(jnp.float32),    # (1, 384)
        "w2": params["w2"].astype(jnp.bfloat16),   # (384, 192)
        "b2": params["b2"].astype(jnp.float32),    # (1, 192)
        "w3t": params["w3"].astype(jnp.float32).T,  # (1, 192)  stays f32 (VPU)
        "b3": params["b3"].astype(jnp.float32),    # (1, 1)
    }


def domain_discriminator(x, params, *, block_b=1024):
    """x: (B, feature_dim) float32 -> (B, 1) float32 logits."""
    B, F = x.shape
    kp = params if "w3t" in params else prepare_params(params)
    w1, b1 = kp["w1"], kp["b1"]
    w2, b2 = kp["w2"], kp["b2"]
    w3t, b3 = kp["w3t"], kp["b3"]
    H1, H2 = w1.shape[1], w2.shape[1]

    # Batch tiling (sublane axis must be a multiple of 8 unless full extent).
    tb = _choose_tile(B, block_b)
    Bp = _round_up(B, tb)
    xb = x.astype(jnp.bfloat16)
    if Bp != B:
        xb = jnp.pad(xb, ((0, Bp - B), (0, 0)))

    flops = 2 * Bp * (F * H1 + H1 * H2 + H2)
    bytes_accessed = (Bp * F * 2                       # x (bf16)
                      + (w1.size + w2.size) * 2        # bf16 weights
                      + (b1.size + b2.size + w3t.size + b3.size) * 4
                      + Bp * 4)                        # (Bp, 1) f32 output

    out = pl.pallas_call(
        _mlp_kernel,
        out_shape=jax.ShapeDtypeStruct((Bp, 1), jnp.float32),
        grid=(Bp // tb,),
        in_specs=[
            pl.BlockSpec((tb, F), lambda i: (i, 0)),    # x tile (bf16)
            pl.BlockSpec((F, H1), lambda i: (0, 0)),    # constant block index:
            pl.BlockSpec((1, H1), lambda i: (0, 0)),    #   weights / biases
            pl.BlockSpec((H1, H2), lambda i: (0, 0)),   #   stay resident in
            pl.BlockSpec((1, H2), lambda i: (0, 0)),    #   VMEM across all
            pl.BlockSpec((1, H2), lambda i: (0, 0)),    #   batch tiles
            pl.BlockSpec((1, 1), lambda i: (0, 0)),
        ],
        out_specs=pl.BlockSpec((tb, 1), lambda i: (i, 0)),
        compiler_params=pltpu.CompilerParams(
            dimension_semantics=("parallel",),          # v7x: shard over 2 TCs
            vmem_limit_bytes=32 * 1024 * 1024),
        cost_estimate=pl.CostEstimate(
            flops=flops, transcendentals=0, bytes_accessed=bytes_accessed),
    )(xb, w1, b1, w2, b2, w3t, b3)

    return out if Bp == B else out[:B]


# --------------------------------------------------------------------------- #
# Parameter init (PyTorch nn.Linear default: U(-1/sqrt(fan_in), 1/sqrt(fan_in)))
# --------------------------------------------------------------------------- #
def init_params(key, feature_dim=768):
    dims = [(feature_dim, 384), (384, 192), (192, 1)]
    params = {}
    for idx, (fin, fout) in enumerate(dims, start=1):
        key, kw, kb = jax.random.split(key, 3)
        bound = 1.0 / jnp.sqrt(float(fin))
        params[f"w{idx}"] = jax.random.uniform(
            kw, (fin, fout), jnp.float32, -bound, bound)        # stored (in, out)
        params[f"b{idx}"] = jax.random.uniform(
            kb, (1, fout), jnp.float32, -bound, bound)
    return params


# --------------------------------------------------------------------------- #
# Pure-JAX f32 reference (same inference semantics: Dropout = identity)
# --------------------------------------------------------------------------- #
def reference(x, params):
    h = jnp.maximum(x @ params["w1"] + params["b1"], 0.0)
    h = jnp.maximum(h @ params["w2"] + params["b2"], 0.0)
    return h @ params["w3"] + params["b3"]


if __name__ == "__main__":
    key = jax.random.PRNGKey(0)
    kx, kp = jax.random.split(key)
    B, F = 8, 768                                     # feature_dim fixed by module
    x = jax.random.normal(kx, (B, F), jnp.float32)
    params = init_params(kp, feature_dim=F)
    kparams = prepare_params(params)                  # one-time bf16 packing

    out = domain_discriminator(x, kparams)
    out = jax.block_until_ready(out)
    assert out.shape == (B, 1), out.shape

    ref = reference(x, params)
    assert bool(jnp.all(jnp.isfinite(out)))
    # bf16 operands / f32 accumulation => slightly looser tolerance than f32.
    assert jnp.allclose(out, ref, rtol=2e-2, atol=2e-2), \
        float(jnp.max(jnp.abs(out - ref)))
    print("KERNEL_OK")
</pallas_src>

<mosaic_0001>
module attributes {stable_mosaic.version = 11 : i64} {
  func.func @_mlp_kernel(%arg0: i32, %arg1: memref<8x768xbf16, #tpu.memory_space<vmem>>, %arg2: memref<768x384xbf16, #tpu.memory_space<vmem>>, %arg3: memref<1x384xf32, #tpu.memory_space<vmem>>, %arg4: memref<384x192xbf16, #tpu.memory_space<vmem>>, %arg5: memref<1x192xf32, #tpu.memory_space<vmem>>, %arg6: memref<1x192xf32, #tpu.memory_space<vmem>>, %arg7: memref<1x1xf32, #tpu.memory_space<vmem>>, %arg8: memref<8x1xf32, #tpu.memory_space<vmem>>) attributes {dimension_semantics = [#tpu.dimension_semantics<parallel>], iteration_bounds = array<i64: 1>, scalar_prefetch = 0 : i64, scratch_operands = 0 : i64, tpu.core_type = #tpu.core_type<tc>, window_params = [{transform_indices = @transform_0, window_bounds = array<i64: 8, 768>}, {pipeline_mode = #tpu.pipeline_mode<synchronous>, transform_indices = @transform_1, window_bounds = array<i64: 768, 384>}, {pipeline_mode = #tpu.pipeline_mode<synchronous>, transform_indices = @transform_2, window_bounds = array<i64: 1, 384>}, {pipeline_mode = #tpu.pipeline_mode<synchronous>, transform_indices = @transform_3, window_bounds = array<i64: 384, 192>}, {pipeline_mode = #tpu.pipeline_mode<synchronous>, transform_indices = @transform_4, window_bounds = array<i64: 1, 192>}, {pipeline_mode = #tpu.pipeline_mode<synchronous>, transform_indices = @transform_5, window_bounds = array<i64: 1, 192>}, {pipeline_mode = #tpu.pipeline_mode<synchronous>, transform_indices = @transform_6, window_bounds = array<i64: 1, 1>}, {transform_indices = @transform_7, window_bounds = array<i64: 8, 1>}]} {
    %c0 = arith.constant 0 : index
    %c0_0 = arith.constant 0 : index
    %0 = vector.load %arg1[%c0, %c0_0] : memref<8x768xbf16, #tpu.memory_space<vmem>>, vector<8x768xbf16>
    %c0_1 = arith.constant 0 : index
    %c0_2 = arith.constant 0 : index
    %1 = vector.load %arg2[%c0_1, %c0_2] : memref<768x384xbf16, #tpu.memory_space<vmem>>, vector<768x384xbf16>
    %cst = arith.constant dense<0.000000e+00> : vector<8x384xf32>
    %2 = tpu.matmul %0, %1, %cst {dimension_numbers = #tpu.dot_dimension_numbers<[1], [0], [0], [1], [0, 0, 1, 1], [], []>} : vector<8x768xbf16>, vector<768x384xbf16>, vector<8x384xf32> -> vector<8x384xf32>
    %c0_3 = arith.constant 0 : index
    %c0_4 = arith.constant 0 : index
    %3 = vector.load %arg3[%c0_3, %c0_4] : memref<1x384xf32, #tpu.memory_space<vmem>>, vector<1x384xf32>
    %4 = vector.broadcast %3 : vector<1x384xf32> to vector<8x384xf32>
    %5 = arith.addf %2, %4 : vector<8x384xf32>
    %cst_5 = arith.constant 0.000000e+00 : f32
    %6 = vector.broadcast %cst_5 : f32 to vector<8x384xf32>
    %7 = arith.maximumf %5, %6 : vector<8x384xf32>
    %8 = arith.truncf %7 : vector<8x384xf32> to vector<8x384xbf16>
    %c0_6 = arith.constant 0 : index
    %c0_7 = arith.constant 0 : index
    %9 = vector.load %arg4[%c0_6, %c0_7] : memref<384x192xbf16, #tpu.memory_space<vmem>>, vector<384x192xbf16>
    %cst_8 = arith.constant dense<0.000000e+00> : vector<8x192xf32>
    %10 = tpu.matmul %8, %9, %cst_8 {dimension_numbers = #tpu.dot_dimension_numbers<[1], [0], [0], [1], [0, 0, 1, 1], [], []>} : vector<8x384xbf16>, vector<384x192xbf16>, vector<8x192xf32> -> vector<8x192xf32>
    %c0_9 = arith.constant 0 : index
    %c0_10 = arith.constant 0 : index
    %11 = vector.load %arg5[%c0_9, %c0_10] : memref<1x192xf32, #tpu.memory_space<vmem>>, vector<1x192xf32>
    %12 = vector.broadcast %11 : vector<1x192xf32> to vector<8x192xf32>
    %13 = arith.addf %10, %12 : vector<8x192xf32>
    %cst_11 = arith.constant 0.000000e+00 : f32
    %14 = vector.broadcast %cst_11 : f32 to vector<8x192xf32>
    %15 = arith.maximumf %13, %14 : vector<8x192xf32>
    %c0_12 = arith.constant 0 : index
    %c0_13 = arith.constant 0 : index
    %16 = vector.load %arg6[%c0_12, %c0_13] : memref<1x192xf32, #tpu.memory_space<vmem>>, vector<1x192xf32>
    %17 = vector.broadcast %16 : vector<1x192xf32> to vector<8x192xf32>
    %18 = arith.mulf %15, %17 : vector<8x192xf32>
    %cst_14 = arith.constant dense<0.000000e+00> : vector<8xf32>
    %19 = vector.multi_reduction <add>, %18, %cst_14 [1] : vector<8x192xf32> to vector<8xf32>
    %20 = vector.shape_cast %19 : vector<8xf32> to vector<8x1xf32>
    %c0_15 = arith.constant 0 : index
    %c0_16 = arith.constant 0 : index
    %21 = vector.load %arg7[%c0_15, %c0_16] : memref<1x1xf32, #tpu.memory_space<vmem>>, vector<1x1xf32>
    %22 = vector.broadcast %21 : vector<1x1xf32> to vector<8x1xf32>
    %23 = arith.addf %20, %22 : vector<8x1xf32>
    %c0_17 = arith.constant 0 : index
    %c0_18 = arith.constant 0 : index
    %24 = vector.load %arg8[%c0_17, %c0_18] : memref<8x1xf32, #tpu.memory_space<vmem>>, vector<8x1xf32>
    tpu.vector_store %arg8[%c0_17, %c0_18], %23 {strides = array<i32>} : memref<8x1xf32, #tpu.memory_space<vmem>>, vector<8x1xf32>,
    return
  }
  func.func @transform_0(%arg0: i32) -> (i32, i32) {
    %c0_i32 = arith.constant 0 : i32
    %c0_i32_0 = arith.constant 0 : i32
    return %arg0, %c0_i32 : i32, i32
  }
  func.func @transform_1(%arg0: i32) -> (i32, i32) {
    %c0_i32 = arith.constant 0 : i32
    %c0_i32_0 = arith.constant 0 : i32
    %c0_i32_1 = arith.constant 0 : i32
    return %c0_i32, %c0_i32_0 : i32, i32
  }
  func.func @transform_2(%arg0: i32) -> (i32, i32) {
    %c0_i32 = arith.constant 0 : i32
    %c0_i32_0 = arith.constant 0 : i32
    %c0_i32_1 = arith.constant 0 : i32
    return %c0_i32, %c0_i32_0 : i32, i32
  }
  func.func @transform_3(%arg0: i32) -> (i32, i32) {
    %c0_i32 = arith.constant 0 : i32
    %c0_i32_0 = arith.constant 0 : i32
    %c0_i32_1 = arith.constant 0 : i32
    return %c0_i32, %c0_i32_0 : i32, i32
  }
  func.func @transform_4(%arg0: i32) -> (i32, i32) {
    %c0_i32 = arith.constant 0 : i32
    %c0_i32_0 = arith.constant 0 : i32
    %c0_i32_1 = arith.constant 0 : i32
    return %c0_i32, %c0_i32_0 : i32, i32
  }
  func.func @transform_5(%arg0: i32) -> (i32, i32) {
    %c0_i32 = arith.constant 0 : i32
    %c0_i32_0 = arith.constant 0 : i32
    %c0_i32_1 = arith.constant 0 : i32
    return %c0_i32, %c0_i32_0 : i32, i32
  }
  func.func @transform_6(%arg0: i32) -> (i32, i32) {
    %c0_i32 = arith.constant 0 : i32
    %c0_i32_0 = arith.constant 0 : i32
    %c0_i32_1 = arith.constant 0 : i32
    return %c0_i32, %c0_i32_0 : i32, i32
  }
  func.func @transform_7(%arg0: i32) -> (i32, i32) {
    %c0_i32 = arith.constant 0 : i32
    %c0_i32_0 = arith.constant 0 : i32
    return %arg0, %c0_i32 : i32, i32
  }
}

</mosaic_0001>

<bundles_post_ra>
// kernel: tpu_custom_call.1
= control target key start
LH: loop header
LB: loop body
LE: loop exit
PB: predicated region body
PF: predicated region fallthrough
CT: control target
= control target key end

     0   :  { %s2522_s0 = inlined_call_operand.vmem [shape: bf16[8,768], index: 0, kind: input, shape index: {}]   ;;  %s2523_s1 = inlined_call_operand.hbm [shape: bf16[768,384], index: 1, kind: input, shape index: {}]   ;;  %s2524_s2 = inlined_call_operand.vmem [shape: f32[1,384], index: 2, kind: input, shape index: {}]   ;;  %s2525_s3 = inlined_call_operand.vmem [shape: bf16[384,192], index: 3, kind: input, shape index: {}]   ;;  %s2526_s4 = inlined_call_operand.vmem [shape: f32[1,192], index: 4, kind: input, shape index: {}]   ;;  %s2527_s5 = inlined_call_operand.vmem [shape: f32[1,192], index: 5, kind: input, shape index: {}]   ;;  %s2528_s6 = inlined_call_operand.<no memory space> [shape: f32[1,1], index: 6, kind: input, shape index: {}]   ;;  %s2529_s7 = inlined_call_operand.vmem [shape: f32[8,1], index: 7, kind: output, shape index: {}]  }
   0x1   :  { %v12_v0 = vstv %s2528_s6 }
   0x2   :  { %13 = vst [vmem:[#allocation2] sm:$0x1] %v12_v0 }
   0x3   :  { %14 = vsyncpa [#allocation4], 0  ;;  %s2272_s26 = smov [#allocation3]  }
   0x4   :  { %s22_s27 = sshll.u32 %s2272_s26, 4  ;;  %s23_s27 = int_to_ptr.vmem [resolvable:$true] %s22_s27 }
   0x5   :  { %s2258_s28 = scalar_lea.vmem %s23_s27, 18432  ;;  %p2263_p1 = scmp.lt.s32.totalorder %s23_s27, %s23_s27 }
   0x6   :  { %p2259_p0 = scmp.ne.s32.totalorder %s23_s27, %s2258_s28  ;;  %p2264_p2 = scmp.lt.s32.totalorder %s2258_s28, %s2258_s28 }
   0x8   :  { %p2265_p3 = por %p2264_p2, %p2263_p1 }
   0xa   :  { %p2266_p4 = pnand %p2265_p3, %p2259_p0 }
   0xc   :  { %2269 = shalt.err (!%p2266_p4)
}
   0xd   :  { %s2273_s29 = smov 192   ;;  %s2274_s30 = smov 12  }
   0xe   :  { %28 = dma.hbm_to_vmem [thread:$0]  %s2523_s1, 18432, %s23_s27, [#allocation4], %s2273_s29, %s2273_s29, %s2274_s30  }
   0xf   :  { %2270 = dma.done.wait [#allocation4], 18432  }
  0x10   :  { %2271 = vsyncadd [#allocation4], 4294948864  ;;  %v1980_v1 = vld [vmem:[#allocation3 + $0xac] ss:$12 sps:$4 sm:$0xff]   ;;  %v1984_v3 = vld [vmem:[#allocation3 + $0xa8] ss:$12 sps:$4 sm:$0xff]  }
  0x11   :  { %v1982_v2 = vld [vmem:[#allocation3 + $0x22c] ss:$12 sps:$4 sm:$0xff]   ;;  %1044 = vmatprep.subr.bf16.mxu0 %v1980_v1  ;;  %v1985_v4 = vld [vmem:[#allocation3 + $0x228] ss:$12 sps:$4 sm:$0xff]   ;;  %v1990_v7 = vld [vmem:[#allocation3 + $0x90] ss:$12 sps:$4 sm:$0xff]  }
  0x12   :  { %1085 = vmatprep.subr.bf16.mxu1 %v1982_v2  ;;  %v1986_v5 = vld [vmem:[#allocation3 + $0x94] ss:$12 sps:$4 sm:$0xff]   ;;  %1045 = vmatpush1.bf16.msra.mxu0 %v1984_v3  ;;  %v1991_v8 = vld [vmem:[#allocation3 + $0x210] ss:$12 sps:$4 sm:$0xff]   ;;  %v1996_v11 = vld [vmem:[#allocation3 + $0x78] ss:$12 sps:$4 sm:$0xff]  }
  0x13   :  { %1086 = vmatpush1.bf16.msra.mxu1 %v1985_v4  ;;  %v1988_v6 = vld [vmem:[#allocation3 + $0x214] ss:$12 sps:$4 sm:$0xff]   ;;  %1046 = vmatprep.subr.bf16.mxu0 %v1986_v5  ;;  %v1992_v9 = vld [vmem:[#allocation3 + $0x7c] ss:$12 sps:$4 sm:$0xff]   ;;  %v1997_v12 = vld [vmem:[#allocation3 + $0x1f8] ss:$12 sps:$4 sm:$0xff]  }
  0x14   :  { %1087 = vmatprep.subr.bf16.mxu1 %v1988_v6  ;;  %v1994_v10 = vld [vmem:[#allocation3 + $0x1fc] ss:$12 sps:$4 sm:$0xff]   ;;  %v1998_v13 = vld [vmem:[#allocation3 + $0x64] ss:$12 sps:$4 sm:$0xff]   ;;  %v2002_v15 = vld [vmem:[#allocation3 + $0x60] ss:$12 sps:$4 sm:$0xff]  }
  0x15   :  { %v2000_v14 = vld [vmem:[#allocation3 + $0x1e4] ss:$12 sps:$4 sm:$0xff]   ;;  %v2003_v16 = vld [vmem:[#allocation3 + $0x1e0] ss:$12 sps:$4 sm:$0xff]   ;;  %v2008_v19 = vld [vmem:[#allocation3 + $0x48] ss:$12 sps:$4 sm:$0xff]  }
  0x16   :  { %1047 = vmatpush1.bf16.msra.mxu0 %v1990_v7  ;;  %v2004_v17 = vld [vmem:[#allocation3 + $0x4c] ss:$12 sps:$4 sm:$0xff]   ;;  %v2009_v20 = vld [vmem:[#allocation3 + $0x1c8] ss:$12 sps:$4 sm:$0xff]   ;;  %v2014_v23 = vld [vmem:[#allocation3 + $0x30] ss:$12 sps:$4 sm:$0xff]  }
  0x17   :  { %1088 = vmatpush1.bf16.msra.mxu1 %v1991_v8  ;;  %1048 = vmatprep.subr.bf16.mxu0 %v1992_v9  ;;  %v2006_v18 = vld [vmem:[#allocation3 + $0x1cc] ss:$12 sps:$4 sm:$0xff]   ;;  %v2010_v21 = vld [vmem:[#allocation3 + $0x34] ss:$12 sps:$4 sm:$0xff]   ;;  %v2015_v24 = vld [vmem:[#allocation3 + $0x1b0] ss:$12 sps:$4 sm:$0xff]  }
  0x18   :  { %1089 = vmatprep.subr.bf16.mxu1 %v1994_v10  ;;  %v2012_v22 = vld [vmem:[#allocation3 + $0x1b4] ss:$12 sps:$4 sm:$0xff]   ;;  %v2016_v25 = vld [vmem:[#allocation3 + $0x1c] ss:$12 sps:$4 sm:$0xff]   ;;  %v2020_v27 = vld [vmem:[#allocation3 + $0x18] ss:$12 sps:$4 sm:$0xff]  }
  0x19   :  { %v2018_v26 = vld [vmem:[#allocation3 + $0x19c] ss:$12 sps:$4 sm:$0xff]   ;;  %v2021_v28 = vld [vmem:[#allocation3 + $0x198] ss:$12 sps:$4 sm:$0xff]   ;;  %v2026_v31 = vld [vmem:[#allocation3] ss:$12 sps:$4 sm:$0xff]  }
  0x1a   :  { %1049 = vmatpush1.bf16.msra.mxu0 %v1996_v11  ;;  %v2022_v29 = vld [vmem:[#allocation3 + $0x4] ss:$12 sps:$4 sm:$0xff]   ;;  %v2027_v32 = vld [vmem:[#allocation3 + $0x180] ss:$12 sps:$4 sm:$0xff]   ;;  %v2032_v35 = vld [vmem:[#allocation3 + $0x168] ss:$12 sps:$4 sm:$0xff]  }
  0x1b   :  { %1090 = vmatpush1.bf16.msra.mxu1 %v1997_v12  ;;  %1050 = vmatprep.subr.bf16.mxu0 %v1998_v13  ;;  %v2024_v30 = vld [vmem:[#allocation3 + $0x184] ss:$12 sps:$4 sm:$0xff]   ;;  %v2028_v33 = vld [vmem:[#allocation3 + $0x16c] ss:$12 sps:$4 sm:$0xff]   ;;  %v2033_v36 = vld [vmem:[#allocation3 + $0x2e8] ss:$12 sps:$4 sm:$0xff]  }
  0x1c   :  { %1091 = vmatprep.subr.bf16.mxu1 %v2000_v14  ;;  %v2030_v34 = vld [vmem:[#allocation3 + $0x2ec] ss:$12 sps:$4 sm:$0xff]   ;;  %v2034_v37 = vld [vmem:[#allocation3 + $0x154] ss:$12 sps:$4 sm:$0xff]   ;;  %v2038_v39 = vld [vmem:[#allocation3 + $0x150] ss:$12 sps:$4 sm:$0xff]  }
  0x1d   :  { %v2036_v38 = vld [vmem:[#allocation3 + $0x2d4] ss:$12 sps:$4 sm:$0xff]   ;;  %v2039_v40 = vld [vmem:[#allocation3 + $0x2d0] ss:$12 sps:$4 sm:$0xff]   ;;  %v2044_v43 = vld [vmem:[#allocation3 + $0x138] ss:$12 sps:$4 sm:$0xff]  }
  0x1e   :  { %1051 = vmatpush1.bf16.msra.mxu0 %v2002_v15  ;;  %v2040_v41 = vld [vmem:[#allocation3 + $0x13c] ss:$12 sps:$4 sm:$0xff]   ;;  %v2045_v44 = vld [vmem:[#allocation3 + $0x2b8] ss:$12 sps:$4 sm:$0xff]   ;;  %v2050_v47 = vld [vmem:[#allocation3 + $0x120] ss:$12 sps:$4 sm:$0xff]  }
  0x1f   :  { %1092 = vmatpush1.bf16.msra.mxu1 %v2003_v16  ;;  %1052 = vmatprep.subr.bf16.mxu0 %v2004_v17  ;;  %v2042_v42 = vld [vmem:[#allocation3 + $0x2bc] ss:$12 sps:$4 sm:$0xff]   ;;  %v2046_v45 = vld [vmem:[#allocation3 + $0x124] ss:$12 sps:$4 sm:$0xff]   ;;  %v2051_v51 = vld [vmem:[#allocation3 + $0x2a0] ss:$12 sps:$4 sm:$0xff]  }
  0x20   :  { %1093 = vmatprep.subr.bf16.mxu1 %v2006_v18  ;;  %v2048_v46 = vld [vmem:[#allocation3 + $0x2a4] ss:$12 sps:$4 sm:$0xff]   ;;  %v2052_v52 = vld [vmem:[#allocation3 + $0x10c] ss:$12 sps:$4 sm:$0xff]   ;;  %v2056_v55 = vld [vmem:[#allocation3 + $0x108] ss:$12 sps:$4 sm:$0xff]  }
  0x21   :  { %v43_v48 = vld [vmem:[%s2522_s0] sm:$0xff]  ;;  %v44_v50 = vld [vmem:[%s2522_s0 + $0x8] sm:$0xff]  ;;  %vm1691_vm0 = vcmask 523264   ;;  %vm1704_vm1 = vcmask 7168  }
  0x22   :  { %1053 = vmatpush1.bf16.msra.mxu0 %v2008_v19  ;;  %v2325_v49 = vcombine.high %v43_v48, %v43_v48  ;;  %v2330_v53 = vcombine.high %v44_v50, %v44_v50  ;;  %v2054_v54 = vld [vmem:[#allocation3 + $0x28c] ss:$12 sps:$4 sm:$0xff]   ;;  %v2057_v56 = vld [vmem:[#allocation3 + $0x288] ss:$12 sps:$4 sm:$0xff]   ;;  %v2062_v59 = vld [vmem:[#allocation3 + $0xf0] ss:$12 sps:$4 sm:$0xff]   ;;  %v2334_v7 = vcombine.low %v43_v48, %v43_v48  ;;  %v2336_v8 = vcombine.low %v44_v50, %v44_v50 }
  0x23   :  { %1094 = vmatpush1.bf16.msra.mxu1 %v2009_v20  ;;  %1054 = vmatprep.subr.bf16.mxu0 %v2010_v21  ;;  %v2058_v57 = vld [vmem:[#allocation3 + $0xf4] ss:$12 sps:$4 sm:$0xff]   ;;  %v2063_v60 = vld [vmem:[#allocation3 + $0x270] ss:$12 sps:$4 sm:$0xff]   ;;  %v2068_v63 = vld [vmem:[#allocation3 + $0xd8] ss:$12 sps:$4 sm:$0xff]  }
  0x24   :  { %1095 = vmatprep.subr.bf16.mxu1 %v2012_v22  ;;  %1076 = vmatprep.mubr.bf16.mxu0 %v2325_v49  ;;  %v2060_v58 = vld [vmem:[#allocation3 + $0x274] ss:$12 sps:$4 sm:$0xff]   ;;  %v2064_v61 = vld [vmem:[#allocation3 + $0xdc] ss:$12 sps:$4 sm:$0xff]   ;;  %v2069_v0 = vld [vmem:[#allocation3 + $0x258] ss:$12 sps:$4 sm:$0xff]  }
  0x25   :  { %1117 = vmatprep.mubr.bf16.mxu1 %v2330_v53  ;;  %v2066_v62 = vld [vmem:[#allocation3 + $0x25c] ss:$12 sps:$4 sm:$0xff]   ;;  %v2070_v1 = vld [vmem:[#allocation3 + $0xc4] ss:$12 sps:$4 sm:$0xff]   ;;  %v2074_v3 = vld [vmem:[#allocation3 + $0xc0] ss:$12 sps:$4 sm:$0xff]  }
  0x26   :  { %1055 = vmatpush1.bf16.msra.mxu0 %v2014_v23  ;;  %v2072_v2 = vld [vmem:[#allocation3 + $0x244] ss:$12 sps:$4 sm:$0xff]   ;;  %v2075_v4 = vld [vmem:[#allocation3 + $0x240] ss:$12 sps:$4 sm:$0xff]   ;;  %v2080_v9 = vld [vmem:[#allocation3 + $0x3a8] ss:$12 sps:$4 sm:$0xff]  }
  0x27   :  { %1096 = vmatpush1.bf16.msra.mxu1 %v2015_v24  ;;  %1056 = vmatprep.subr.bf16.mxu0 %v2016_v25  ;;  %v2082_v5 = vld [vmem:[#allocation3 + $0x3ac] ss:$12 sps:$4 sm:$0xff]   ;;  %v2083_v6 = vld [vmem:[#allocation3 + $0x170] ss:$12 sps:$4 sm:$0xff]   ;;  %v2087_v11 = vld [vmem:[#allocation3 + $0x394] ss:$12 sps:$4 sm:$0xff]  }
  0x28   :  { %1097 = vmatprep.subr.bf16.mxu1 %v2018_v26  ;;  %v2084_v10 = vld [vmem:[#allocation3 + $0xb0] ss:$12 sps:$4 sm:$0xff]   ;;  %v2088_v12 = vld [vmem:[#allocation3 + $0x158] ss:$12 sps:$4 sm:$0xff]   ;;  %v2093_v16 = vld [vmem:[#allocation3 + $0x140] ss:$12 sps:$4 sm:$0xff]  }
  0x29   :  { %v2085_v13 = vld [vmem:[#allocation3 + $0x390] ss:$12 sps:$4 sm:$0xff]   ;;  %v2089_v14 = vld [vmem:[#allocation3 + $0x98] ss:$12 sps:$4 sm:$0xff]   ;;  %v2094_v18 = vld [vmem:[#allocation3 + $0x80] ss:$12 sps:$4 sm:$0xff]  }
  0x2a   :  { %1057 = vmatpush1.bf16.msra.mxu0 %v2020_v27  ;;  %v2092_v15 = vld [vmem:[#allocation3 + $0x37c] ss:$12 sps:$4 sm:$0xff]   ;;  %v2090_v17 = vld [vmem:[#allocation3 + $0x378] ss:$12 sps:$4 sm:$0xff]   ;;  %v2095_v21 = vld [vmem:[#allocation3 + $0x360] ss:$12 sps:$4 sm:$0xff]  }
  0x2b   :  { %1098 = vmatpush1.bf16.msra.mxu1 %v2021_v28  ;;  %1058 = vmatprep.subr.bf16.mxu0 %v2022_v29  ;;  %v2097_v19 = vld [vmem:[#allocation3 + $0x364] ss:$12 sps:$4 sm:$0xff]   ;;  %v2098_v20 = vld [vmem:[#allocation3 + $0x128] ss:$12 sps:$4 sm:$0xff]   ;;  %v2102_v23 = vld [vmem:[#allocation3 + $0x34c] ss:$12 sps:$4 sm:$0xff]  }
  0x2c   :  { %1099 = vmatprep.subr.bf16.mxu1 %v2024_v30  ;;  %v2099_v22 = vld [vmem:[#allocation3 + $0x68] ss:$12 sps:$4 sm:$0xff]   ;;  %v2103_v24 = vld [vmem:[#allocation3 + $0x110] ss:$12 sps:$4 sm:$0xff]   ;;  %v2108_v28 = vld [vmem:[#allocation3 + $0xf8] ss:$12 sps:$4 sm:$0xff]  }
  0x2d   :  { %v2100_v25 = vld [vmem:[#allocation3 + $0x348] ss:$12 sps:$4 sm:$0xff]   ;;  %v2104_v26 = vld [vmem:[#allocation3 + $0x50] ss:$12 sps:$4 sm:$0xff]   ;;  %v2109_v30 = vld [vmem:[#allocation3 + $0x38] ss:$12 sps:$4 sm:$0xff]  }
  0x2e   :  { %1059 = vmatpush1.bf16.msra.mxu0 %v2026_v31  ;;  %v2107_v27 = vld [vmem:[#allocation3 + $0x334] ss:$12 sps:$4 sm:$0xff]   ;;  %v2105_v29 = vld [vmem:[#allocation3 + $0x330] ss:$12 sps:$4 sm:$0xff]   ;;  %v2129_v48 = vld [vmem:[#allocation3 + $0x218] ss:$12 sps:$4 sm:$0xff]  }
  0x2f   :  { %1100 = vmatpush1.bf16.msra.mxu1 %v2027_v32  ;;  %1060 = vmatprep.subr.bf16.mxu0 %v2028_v33  ;;  %v2112_v31 = vld [vmem:[#allocation3 + $0x31c] ss:$12 sps:$4 sm:$0xff]   ;;  %v2113_v32 = vld [vmem:[#allocation3 + $0xe0] ss:$12 sps:$4 sm:$0xff]   ;;  %v2110_v33 = vld [vmem:[#allocation3 + $0x318] ss:$12 sps:$4 sm:$0xff]  }
  0x30   :  { %1101 = vmatprep.subr.bf16.mxu1 %v2030_v34  ;;  %v2114_v34 = vld [vmem:[#allocation3 + $0x20] ss:$12 sps:$4 sm:$0xff]  }
  0x31   :  { %v2133_v50 = vld [vmem:[#allocation3 + $0x2c0] ss:$12 sps:$4 sm:$0xff]  }
  0x32   :  { %1061 = vmatpush2.bf16.msra.mxu0 %v2032_v35  ;;  %v2117_v35 = vld [vmem:[#allocation3 + $0x304] ss:$12 sps:$4 sm:$0xff]  }
  0x33   :  { %1102 = vmatpush2.bf16.msra.mxu1 %v2033_v36  ;;  %1062 = vmatprep.subr.bf16.mxu0 %v2034_v37  ;;  %v2118_v36 = vld [vmem:[#allocation3 + $0xc8] ss:$12 sps:$4 sm:$0xff]   ;;  %v2115_v37 = vld [vmem:[#allocation3 + $0x300] ss:$12 sps:$4 sm:$0xff]  }
  0x34   :  { %1103 = vmatprep.subr.bf16.mxu1 %v2036_v38  ;;  %v2119_v38 = vld [vmem:[#allocation3 + $0x8] ss:$12 sps:$4 sm:$0xff]  }
  0x36   :  { %1063 = vmatpush2.bf16.msra.mxu0 %v2038_v39  ;;  %v2122_v39 = vld [vmem:[#allocation3 + $0x46c] ss:$12 sps:$4 sm:$0xff]  }
  0x37   :  { %1104 = vmatpush2.bf16.msra.mxu1 %v2039_v40  ;;  %1064 = vmatprep.subr.bf16.mxu0 %v2040_v41  ;;  %v2123_v40 = vld [vmem:[#allocation3 + $0x2f0] ss:$12 sps:$4 sm:$0xff]   ;;  %v2120_v41 = vld [vmem:[#allocation3 + $0x468] ss:$12 sps:$4 sm:$0xff]  }
  0x38   :  { %1105 = vmatprep.subr.bf16.mxu1 %v2042_v42  ;;  %v2124_v42 = vld [vmem:[#allocation3 + $0x230] ss:$12 sps:$4 sm:$0xff]  }
  0x3a   :  { %1065 = vmatpush2.bf16.msra.mxu0 %v2044_v43  ;;  %v2127_v43 = vld [vmem:[#allocation3 + $0x454] ss:$12 sps:$4 sm:$0xff]  }
  0x3b   :  { %1106 = vmatpush2.bf16.msra.mxu1 %v2045_v44  ;;  %1066 = vmatprep.subr.bf16.mxu0 %v2046_v45  ;;  %v2344_v44 = vld [vmem:[%s2522_s0 + $0x10] sm:$0xff]  ;;  %v2128_v45 = vld [vmem:[#allocation3 + $0x2d8] ss:$12 sps:$4 sm:$0xff]  }
  0x3c   :  { %1107 = vmatprep.subr.bf16.mxu1 %v2048_v46  ;;  %v2348_v46 = vcombine.high %v2344_v44, %v2344_v44 }
  0x3e   :  { %1067 = vmatpush2.bf16.msra.mxu0 %v2050_v47  ;;  %v2125_v47 = vld [vmem:[#allocation3 + $0x450] ss:$12 sps:$4 sm:$0xff]  }
  0x3f   :  { %1108 = vmatpush2.bf16.msra.mxu1 %v2051_v51  ;;  %1068 = vmatprep.subr.bf16.mxu0 %v2052_v52  ;;  %v2130_v51 = vld [vmem:[#allocation3 + $0x438] ss:$12 sps:$4 sm:$0xff]   ;;  %v2134_v52 = vld [vmem:[#allocation3 + $0x200] ss:$12 sps:$4 sm:$0xff]  }
  0x40   :  { %1109 = vmatprep.subr.bf16.mxu1 %v2054_v54  ;;  %v2137_v54 = vld [vmem:[#allocation3 + $0x424] ss:$12 sps:$4 sm:$0xff]  }
  0x42   :  { %1069 = vmatpush2.bf16.msra.mxu0 %v2056_v55  ;;  %v2138_v55 = vld [vmem:[#allocation3 + $0x2a8] ss:$12 sps:$4 sm:$0xff]  }
  0x43   :  { %1110 = vmatpush2.bf16.msra.mxu1 %v2057_v56  ;;  %1070 = vmatprep.subr.bf16.mxu0 %v2058_v57  ;;  %v2135_v56 = vld [vmem:[#allocation3 + $0x420] ss:$12 sps:$4 sm:$0xff]   ;;  %v2139_v57 = vld [vmem:[#allocation3 + $0x1e8] ss:$12 sps:$4 sm:$0xff]  }
  0x44   :  { %1111 = vmatprep.subr.bf16.mxu1 %v2060_v58  ;;  %v2142_v58 = vld [vmem:[#allocation3 + $0x40c] ss:$12 sps:$4 sm:$0xff]  }
  0x46   :  { %1071 = vmatpush2.bf16.msra.mxu0 %v2062_v59  ;;  %v2143_v59 = vld [vmem:[#allocation3 + $0x290] ss:$12 sps:$4 sm:$0xff]  }
  0x47   :  { %1112 = vmatpush2.bf16.msra.mxu1 %v2063_v60  ;;  %1072 = vmatprep.subr.bf16.mxu0 %v2064_v61  ;;  %v2140_v60 = vld [vmem:[#allocation3 + $0x408] ss:$12 sps:$4 sm:$0xff]   ;;  %v2144_v61 = vld [vmem:[#allocation3 + $0x1d0] ss:$12 sps:$4 sm:$0xff]  }
  0x48   :  { %1113 = vmatprep.subr.bf16.mxu1 %v2066_v62  ;;  %v2148_v62 = vld [vmem:[#allocation3 + $0x278] ss:$12 sps:$4 sm:$0xff]  }
  0x4a   :  { %1073 = vmatpush2.bf16.msra.mxu0 %v2068_v63  ;;  %v2145_v63 = vld [vmem:[#allocation3 + $0x3f0] ss:$12 sps:$4 sm:$0xff]  }
  0x4b   :  { %1114 = vmatpush2.bf16.msra.mxu1 %v2069_v0  ;;  %1074 = vmatprep.subr.bf16.mxu0 %v2070_v1  ;;  %v2149_v0 = vld [vmem:[#allocation3 + $0x1b8] ss:$12 sps:$4 sm:$0xff]   ;;  %v2152_v1 = vld [vmem:[#allocation3 + $0x3dc] ss:$12 sps:$4 sm:$0xff]  }
  0x4c   :  { %1115 = vmatprep.subr.bf16.mxu1 %v2072_v2  ;;  %v2153_v2 = vld [vmem:[#allocation3 + $0x260] ss:$12 sps:$4 sm:$0xff]  }
  0x4e   :  { %1075 = vmatpush2.bf16.msra.mxu0 %v2074_v3  ;;  %v2150_v3 = vld [vmem:[#allocation3 + $0x3d8] ss:$12 sps:$4 sm:$0xff]  }
  0x4f   :  { %1116 = vmatpush2.bf16.msra.mxu1 %v2075_v4  ;;  %1126 = vmatprep.subr.bf16.mxu0 %v2082_v5  ;;  %v2154_v4 = vld [vmem:[#allocation3 + $0x1a0] ss:$12 sps:$4 sm:$0xff]   ;;  %v2157_v5 = vld [vmem:[#allocation3 + $0x3c4] ss:$12 sps:$4 sm:$0xff]  }
  0x50   :  { %1910 = vmatprep.subr.bf16.mxu1 %v2083_v6  ;;  %v2158_v6 = vld [vmem:[#allocation3 + $0x248] ss:$12 sps:$4 sm:$0xff]  }
  0x51   :  { %1077 = vmatmul.mubr.bf16.vlgmr.msra.gmra.mxu0 %v2334_v7 }
  0x52   :  { %1118 = vmatmul.mubr.bf16.vlgmr.msra.gmra.mxu1 %v2336_v8  ;;  %1127 = vmatpush1.bf16.msra.mxu0 %v2080_v9  ;;  %v2159_v9 = vld [vmem:[#allocation3 + $0x188] ss:$12 sps:$4 sm:$0xff]  }
  0x53   :  { %1911 = vmatpush3.bf16.msra.mxu1 %v2084_v10  ;;  %1128 = vmatprep.subr.bf16.mxu0 %v2087_v11  ;;  %v2162_v10 = vld [vmem:[#allocation3 + $0x470] ss:$12 sps:$4 sm:$0xff]  }
  0x54   :  { %1912 = vmatprep.subr.bf16.mxu1 %v2088_v12  ;;  %1199 = vmatprep.mubr.bf16.mxu1 %v2325_v49  ;;  %v2132_v49 = vld [vmem:[#allocation3 + $0x43c] ss:$12 sps:$4 sm:$0xff]   ;;  %v2355_v12 = vcombine.low %v2344_v44, %v2344_v44 }
  0x55   :  { %1158 = vmatprep.mubr.bf16.mxu0 %v2348_v46  ;;  %v2163_v11 = vld [vmem:[#allocation3 + $0x3b0] ss:$12 sps:$4 sm:$0xff]   ;;  %v2207_v44 = vld [vmem:[%s2525_s3 + $0xe4] ss:$8 sps:$4 sm:$0xff]  }
  0x56   :  { %1129 = vmatpush1.bf16.msra.mxu0 %v2085_v13  ;;  %v2164_v13 = vld [vmem:[#allocation3 + $0x458] ss:$12 sps:$4 sm:$0xff]  }
  0x57   :  { %1913 = vmatpush3.bf16.msra.mxu1 %v2089_v14  ;;  %1130 = vmatprep.subr.bf16.mxu0 %v2092_v15  ;;  %v2165_v14 = vld [vmem:[#allocation3 + $0x398] ss:$12 sps:$4 sm:$0xff]   ;;  %v2166_v15 = vld [vmem:[#allocation3 + $0x440] ss:$12 sps:$4 sm:$0xff]  }
  0x58   :  { %1914 = vmatprep.subr.bf16.mxu1 %v2093_v16  ;;  %v2167_v16 = vld [vmem:[#allocation3 + $0x380] ss:$12 sps:$4 sm:$0xff]  }
  0x5a   :  { %1131 = vmatpush1.bf16.msra.mxu0 %v2090_v17  ;;  %v2168_v17 = vld [vmem:[#allocation3 + $0x428] ss:$12 sps:$4 sm:$0xff]  }
  0x5b   :  { %1915 = vmatpush3.bf16.msra.mxu1 %v2094_v18  ;;  %1132 = vmatprep.subr.bf16.mxu0 %v2097_v19  ;;  %v2178_v18 = vld [vmem:[%s2525_s3 + $0x70] ss:$8 sps:$4 sm:$0xff]   ;;  %v2180_v19 = vld [vmem:[%s2525_s3 + $0x74] ss:$8 sps:$4 sm:$0xff]  }
  0x5c   :  { %1916 = vmatprep.subr.bf16.mxu1 %v2098_v20  ;;  %v2169_v20 = vld [vmem:[#allocation3 + $0x368] ss:$12 sps:$4 sm:$0xff]  }
  0x5e   :  { %1133 = vmatpush1.bf16.msra.mxu0 %v2095_v21  ;;  %v2181_v21 = vld [vmem:[%s2525_s3 + $0x60] ss:$8 sps:$4 sm:$0xff]  }
  0x5f   :  { %1917 = vmatpush3.bf16.msra.mxu1 %v2099_v22  ;;  %1134 = vmatprep.subr.bf16.mxu0 %v2102_v23  ;;  %v2170_v22 = vld [vmem:[#allocation3 + $0x410] ss:$12 sps:$4 sm:$0xff]  }
  0x60   :  { %1918 = vmatprep.subr.bf16.mxu1 %v2103_v24  ;;  %v2186_v23 = vld [vmem:[%s2525_s3 + $0x54] ss:$8 sps:$4 sm:$0xff]  }
  0x61   :  { %v2171_v24 = vld [vmem:[#allocation3 + $0x350] ss:$12 sps:$4 sm:$0xff]  }
  0x62   :  { %1135 = vmatpush1.bf16.msra.mxu0 %v2100_v25  ;;  %v2184_v25 = vld [vmem:[%s2525_s3 + $0x50] ss:$8 sps:$4 sm:$0xff]  }
  0x63   :  { %1919 = vmatpush3.bf16.msra.mxu1 %v2104_v26  ;;  %1136 = vmatprep.subr.bf16.mxu0 %v2107_v27  ;;  %v2172_v26 = vld [vmem:[#allocation3 + $0x3f8] ss:$12 sps:$4 sm:$0xff]  }
  0x64   :  { %1920 = vmatprep.subr.bf16.mxu1 %v2108_v28  ;;  %v2189_v27 = vld [vmem:[%s2525_s3 + $0x44] ss:$8 sps:$4 sm:$0xff]  }
  0x65   :  { %v2173_v28 = vld [vmem:[#allocation3 + $0x338] ss:$12 sps:$4 sm:$0xff]  }
  0x66   :  { %1137 = vmatpush1.bf16.msra.mxu0 %v2105_v29  ;;  %v2187_v29 = vld [vmem:[%s2525_s3 + $0x40] ss:$8 sps:$4 sm:$0xff]  }
  0x67   :  { %1921 = vmatpush3.bf16.msra.mxu1 %v2109_v30  ;;  %1138 = vmatprep.subr.bf16.mxu0 %v2112_v31  ;;  %v2174_v30 = vld [vmem:[#allocation3 + $0x3e0] ss:$12 sps:$4 sm:$0xff]   ;;  %v2192_v31 = vld [vmem:[%s2525_s3 + $0x34] ss:$8 sps:$4 sm:$0xff]  }
  0x68   :  { %1922 = vmatprep.subr.bf16.mxu1 %v2113_v32  ;;  %v2175_v32 = vld [vmem:[#allocation3 + $0x320] ss:$12 sps:$4 sm:$0xff]  }
  0x6a   :  { %1139 = vmatpush1.bf16.msra.mxu0 %v2110_v33  ;;  %v2190_v33 = vld [vmem:[%s2525_s3 + $0x30] ss:$8 sps:$4 sm:$0xff]  }
  0x6b   :  { %1923 = vmatpush3.bf16.msra.mxu1 %v2114_v34  ;;  %1140 = vmatprep.subr.bf16.mxu0 %v2117_v35  ;;  %v2176_v34 = vld [vmem:[#allocation3 + $0x3c8] ss:$12 sps:$4 sm:$0xff]  }
  0x6c   :  { %1924 = vmatprep.subr.bf16.mxu1 %v2118_v36  ;;  %v2195_v35 = vld [vmem:[%s2525_s3 + $0x24] ss:$8 sps:$4 sm:$0xff]  }
  0x6d   :  { %v2177_v36 = vld [vmem:[#allocation3 + $0x308] ss:$12 sps:$4 sm:$0xff]  }
  0x6e   :  { %1141 = vmatpush1.bf16.msra.mxu0 %v2115_v37  ;;  %v2193_v37 = vld [vmem:[%s2525_s3 + $0x20] ss:$8 sps:$4 sm:$0xff]  }
  0x6f   :  { %1925 = vmatpush3.bf16.msra.mxu1 %v2119_v38  ;;  %1142 = vmatprep.subr.bf16.mxu0 %v2122_v39  ;;  %v2198_v38 = vld [vmem:[%s2525_s3 + $0x14] ss:$8 sps:$4 sm:$0xff]   ;;  %v2196_v39 = vld [vmem:[%s2525_s3 + $0x10] ss:$8 sps:$4 sm:$0xff]  }
  0x70   :  { %1932 = vmatprep.subr.bf16.mxu1 %v2123_v40  ;;  %v2201_v40 = vld [vmem:[%s2525_s3 + $0x4] ss:$8 sps:$4 sm:$0xff]  }
  0x72   :  { %1200 = vmatmul.mubr.bf16.vlgmr.msra.gmra.mxu1 %v2334_v7  ;;  %1143 = vmatpush2.bf16.msra.mxu0 %v2120_v41  ;;  %v2155_v7 = vld [vmem:[#allocation3 + $0x3c0] ss:$12 sps:$4 sm:$0xff]  }
  0x73   :  { %1933 = vmatpush3.bf16.msra.mxu1 %v2124_v42  ;;  %1144 = vmatprep.subr.bf16.mxu0 %v2127_v43  ;;  %v2199_v41 = vld [vmem:[%s2525_s3] ss:$8 sps:$4 sm:$0xff]   ;;  %v2204_v42 = vld [vmem:[%s2525_s3 + $0xf4] ss:$8 sps:$4 sm:$0xff]   ;;  %v2202_v43 = vld [vmem:[%s2525_s3 + $0xf0] ss:$8 sps:$4 sm:$0xff]  }
  0x74   :  { %1934 = vmatprep.subr.bf16.mxu1 %v2128_v45  ;;  %1239 = vmatprep.mubr.bf16.mxu1 %v2330_v53  ;;  %v2147_v53 = vld [vmem:[#allocation3 + $0x3f4] ss:$12 sps:$4 sm:$0xff]  }
  0x75   :  { %v2205_v45 = vld [vmem:[%s2525_s3 + $0xe0] ss:$8 sps:$4 sm:$0xff]  }
  0x76   :  { %1145 = vmatpush2.bf16.msra.mxu0 %v2125_v47  ;;  %v2208_v47 = vld [vmem:[%s2525_s3 + $0xd0] ss:$8 sps:$4 sm:$0xff]  }
  0x77   :  { %1935 = vmatpush3.bf16.msra.mxu1 %v2129_v48  ;;  %1146 = vmatprep.subr.bf16.mxu0 %v2132_v49  ;;  %v2213_v48 = vld [vmem:[%s2525_s3 + $0xc4] ss:$8 sps:$4 sm:$0xff]   ;;  %v2211_v49 = vld [vmem:[%s2525_s3 + $0xc0] ss:$8 sps:$4 sm:$0xff]  }
  0x78   :  { %1936 = vmatprep.subr.bf16.mxu1 %v2133_v50  ;;  %v2216_v50 = vld [vmem:[%s2525_s3 + $0xb4] ss:$8 sps:$4 sm:$0xff]  }
  0x7a   :  { %1147 = vmatpush2.bf16.msra.mxu0 %v2130_v51  ;;  %v2214_v51 = vld [vmem:[%s2525_s3 + $0xb0] ss:$8 sps:$4 sm:$0xff]  }
  0x7b   :  { %1937 = vmatpush3.bf16.msra.mxu1 %v2134_v52  ;;  %1148 = vmatprep.subr.bf16.mxu0 %v2137_v54  ;;  %v2219_v52 = vld [vmem:[%s2525_s3 + $0xa4] ss:$8 sps:$4 sm:$0xff]   ;;  %v2217_v54 = vld [vmem:[%s2525_s3 + $0xa0] ss:$8 sps:$4 sm:$0xff]  }
  0x7c   :  { %1938 = vmatprep.subr.bf16.mxu1 %v2138_v55  ;;  %v2222_v55 = vld [vmem:[%s2525_s3 + $0x94] ss:$8 sps:$4 sm:$0xff]  }
  0x7e   :  { %1149 = vmatpush2.bf16.msra.mxu0 %v2135_v56  ;;  %v2220_v56 = vld [vmem:[%s2525_s3 + $0x90] ss:$8 sps:$4 sm:$0xff]  }
  0x7f   :  { %1939 = vmatpush3.bf16.msra.mxu1 %v2139_v57  ;;  %1150 = vmatprep.subr.bf16.mxu0 %v2142_v58  ;;  %v2225_v57 = vld [vmem:[%s2525_s3 + $0x84] ss:$8 sps:$4 sm:$0xff]   ;;  %v2223_v58 = vld [vmem:[%s2525_s3 + $0x80] ss:$8 sps:$4 sm:$0xff]  }
  0x80   :  { %1940 = vmatprep.subr.bf16.mxu1 %v2143_v59  ;;  %v2228_v59 = vld [vmem:[%s2525_s3 + $0x174] ss:$8 sps:$4 sm:$0xff]  }
  0x82   :  { %1151 = vmatpush2.bf16.msra.mxu0 %v2140_v60  ;;  %v2226_v60 = vld [vmem:[%s2525_s3 + $0x170] ss:$8 sps:$4 sm:$0xff]  }
  0x83   :  { %1941 = vmatpush3.bf16.msra.mxu1 %v2144_v61  ;;  %1152 = vmatprep.subr.bf16.mxu0 %v2147_v53  ;;  %v2231_v61 = vld [vmem:[%s2525_s3 + $0x164] ss:$8 sps:$4 sm:$0xff]   ;;  %v2229_v53 = vld [vmem:[%s2525_s3 + $0x160] ss:$8 sps:$4 sm:$0xff]  }
  0x84   :  { %1942 = vmatprep.subr.bf16.mxu1 %v2148_v62  ;;  %v2234_v62 = vld [vmem:[%s2525_s3 + $0x154] ss:$8 sps:$4 sm:$0xff]  }
  0x86   :  { %1153 = vmatpush2.bf16.msra.mxu0 %v2145_v63  ;;  %v2232_v63 = vld [vmem:[%s2525_s3 + $0x150] ss:$8 sps:$4 sm:$0xff]  }
  0x87   :  { %1943 = vmatpush3.bf16.msra.mxu1 %v2149_v0  ;;  %1154 = vmatprep.subr.bf16.mxu0 %v2152_v1  ;;  %v2237_v0 = vld [vmem:[%s2525_s3 + $0x144] ss:$8 sps:$4 sm:$0xff]   ;;  %v2235_v1 = vld [vmem:[%s2525_s3 + $0x140] ss:$8 sps:$4 sm:$0xff]  }
  0x88   :  { %1944 = vmatprep.subr.bf16.mxu1 %v2153_v2  ;;  %v2240_v2 = vld [vmem:[%s2525_s3 + $0x134] ss:$8 sps:$4 sm:$0xff]  }
  0x8a   :  { %1155 = vmatpush2.bf16.msra.mxu0 %v2150_v3  ;;  %v2238_v3 = vld [vmem:[%s2525_s3 + $0x130] ss:$8 sps:$4 sm:$0xff]  }
  0x8b   :  { %1945 = vmatpush3.bf16.msra.mxu1 %v2154_v4  ;;  %1156 = vmatprep.subr.bf16.mxu0 %v2157_v5  ;;  %v2243_v4 = vld [vmem:[%s2525_s3 + $0x124] ss:$8 sps:$4 sm:$0xff]   ;;  %v2241_v5 = vld [vmem:[%s2525_s3 + $0x120] ss:$8 sps:$4 sm:$0xff]  }
  0x8c   :  { %1946 = vmatprep.subr.bf16.mxu1 %v2158_v6  ;;  %v2246_v6 = vld [vmem:[%s2525_s3 + $0x114] ss:$8 sps:$4 sm:$0xff]  }
  0x8e   :  { %1157 = vmatpush2.bf16.msra.mxu0 %v2155_v7  ;;  %v2244_v7 = vld [vmem:[%s2525_s3 + $0x110] ss:$8 sps:$4 sm:$0xff]  }
  0x8f   :  { %1947 = vmatpush3.bf16.msra.mxu1 %v2159_v9  ;;  %1954 = vmatprep.subr.bf16.mxu0 %v2162_v10  ;;  %v2249_v9 = vld [vmem:[%s2525_s3 + $0x104] ss:$8 sps:$4 sm:$0xff]   ;;  %v2247_v10 = vld [vmem:[%s2525_s3 + $0x100] ss:$8 sps:$4 sm:$0xff]  }
  0x90   :  { %1593 = vmatprep.subr.bf16.mxu1 %v2180_v19 }
  0x91   :  { %1159 = vmatmul.mubr.bf16.vlgmr.msra.gmra.mxu0 %v2355_v12 }
  0x92   :  { %1240 = vmatmul.mubr.bf16.vlgmr.msra.gmra.mxu1 %v2336_v8  ;;  %1955 = vmatpush3.bf16.msra.mxu0 %v2163_v11  ;;  %v2183_v8 = vld [vmem:[%s2525_s3 + $0x64] ss:$8 sps:$4 sm:$0xff]   ;;  %v2275_v11 = vmov 0  }
  0x93   :  { %1279 = vmatprep.mubr.bf16.mxu0 %v2348_v46  ;;  %1956 = vmatprep.subr.bf16.mxu0 %v2164_v13  ;;  %v2210_v46 = vld [vmem:[%s2525_s3 + $0xd4] ss:$8 sps:$4 sm:$0xff]  }
  0x94   :  { %1594 = vmatpush1.bf16.msra.mxu1 %v2178_v18 }
  0x95   :  { %1595 = vmatprep.subr.bf16.mxu1 %v2183_v8 }
  0x96   :  { %1957 = vmatpush3.bf16.msra.mxu0 %v2165_v14 }
  0x97   :  { %1958 = vmatprep.subr.bf16.mxu0 %v2166_v15 }
  0x98   :  { %1596 = vmatpush1.bf16.msra.mxu1 %v2181_v21 }
  0x99   :  { %1597 = vmatprep.subr.bf16.mxu1 %v2186_v23  ;;  %v240_v23 = vlaneseq }
  0x9a   :  { %1959 = vmatpush3.bf16.msra.mxu0 %v2167_v16 }
  0x9b   :  { %1960 = vmatprep.subr.bf16.mxu0 %v2168_v17 }
  0x9c   :  { %1598 = vmatpush1.bf16.msra.mxu1 %v2184_v25 }
  0x9d   :  { %1599 = vmatprep.subr.bf16.mxu1 %v2189_v27 }
  0x9e   :  { %1961 = vmatpush3.bf16.msra.mxu0 %v2169_v20 }
  0x9f   :  { %1962 = vmatprep.subr.bf16.mxu0 %v2170_v22 }
  0xa0   :  { %1600 = vmatpush1.bf16.msra.mxu1 %v2187_v29 }
  0xa1   :  { %1601 = vmatprep.subr.bf16.mxu1 %v2192_v31 }
  0xa2   :  { %1963 = vmatpush3.bf16.msra.mxu0 %v2171_v24  ;;  %v241_v24 = vshrl.u32 %v240_v23, 7 }
  0xa3   :  { %1964 = vmatprep.subr.bf16.mxu0 %v2172_v26  ;;  %v238_v26 = vld [vmem:[%s2524_s2] sm:$0x7] }
  0xa4   :  { %1602 = vmatpush1.bf16.msra.mxu1 %v2190_v33  ;;  %v2505_v25 = vsub.s32 0, %v241_v24  ;;  %v246_v27 = vsub.s32 1, %v241_v24 }
  0xa5   :  { %1603 = vmatprep.subr.bf16.mxu1 %v2195_v35 }
  0xa6   :  { %1965 = vmatpush3.bf16.msra.mxu0 %v2173_v28  ;;  %v243_v28 = vrot.slane %v238_v26, %v2505_v25  ;;  %v247_v29 = vrot.slane %v238_v26, %v246_v27 }
  0xa7   :  { %1966 = vmatprep.subr.bf16.mxu0 %v2174_v30 }
  0xa8   :  { %1604 = vmatpush1.bf16.msra.mxu1 %v2193_v37 }
  0xa9   :  { %1605 = vmatprep.subr.bf16.mxu1 %v2198_v38 }
  0xaa   :  { %1967 = vmatpush3.bf16.msra.mxu0 %v2175_v32 }
  0xab   :  { %1968 = vmatprep.subr.bf16.mxu0 %v2176_v34 }
  0xac   :  { %1606 = vmatpush1.bf16.msra.mxu1 %v2196_v39 }
  0xad   :  { %1607 = vmatprep.subr.bf16.mxu1 %v2201_v40 }
  0xae   :  { %1969 = vmatpush3.bf16.msra.mxu0 %v2177_v36 }
  0xaf   :  { %1634 = vmatprep.subr.bf16.mxu0 %v2228_v59 }
  0xb0   :  { %1608 = vmatpush1.bf16.msra.mxu1 %v2199_v41 }
  0xb1   :  { %1280 = vmatmul.mubr.bf16.vlgmr.msra.gmra.mxu0 %v2355_v12  ;;  %1609 = vmatprep.subr.bf16.mxu1 %v2204_v42 }
  0xb2   :  { %1635 = vmatpush1.bf16.msra.mxu0 %v2226_v60  ;;  %1666 = vmatprep.mubr.bf16.mxu0 %v2275_v11 }
  0xb3   :  { %1636 = vmatprep.subr.bf16.mxu0 %v2231_v61 }
  0xb4   :  { %1610 = vmatpush2.bf16.msra.mxu1 %v2202_v43 }
  0xb5   :  { %1611 = vmatprep.subr.bf16.mxu1 %v2207_v44 }
  0xb6   :  { %1637 = vmatpush1.bf16.msra.mxu0 %v2229_v53 }
  0xb7   :  { %1638 = vmatprep.subr.bf16.mxu0 %v2234_v62 }
  0xb8   :  { %1612 = vmatpush2.bf16.msra.mxu1 %v2205_v45 }
  0xb9   :  { %1613 = vmatprep.subr.bf16.mxu1 %v2210_v46 }
  0xba   :  { %1639 = vmatpush1.bf16.msra.mxu0 %v2232_v63 }
  0xbb   :  { %1640 = vmatprep.subr.bf16.mxu0 %v2237_v0 }
  0xbc   :  { %1614 = vmatpush2.bf16.msra.mxu1 %v2208_v47 }
  0xbd   :  { %1615 = vmatprep.subr.bf16.mxu1 %v2213_v48  ;;  %v250_v48 = vsub.s32 2, %v241_v24 }
  0xbe   :  { %1641 = vmatpush1.bf16.msra.mxu0 %v2235_v1 }
  0xbf   :  { %1642 = vmatprep.subr.bf16.mxu0 %v2240_v2  ;;  %v1341_v2 = vld [vmem:[%s2526_s4] sm:$0x3] }
  0xc0   :  { %1616 = vmatpush2.bf16.msra.mxu1 %v2211_v49  ;;  %v251_v49 = vrot.slane %v238_v26, %v250_v48 }
  0xc1   :  { %1617 = vmatprep.subr.bf16.mxu1 %v2216_v50 }
  0xc2   :  { %1643 = vmatpush1.bf16.msra.mxu0 %v2238_v3  ;;  %v1346_v3 = vrot.slane %v1341_v2, %v2505_v25 }
  0xc3   :  { %1644 = vmatprep.subr.bf16.mxu0 %v2243_v4  ;;  %v1350_v4 = vrot.slane %v1341_v2, %v246_v27 }
  0xc4   :  { %1618 = vmatpush2.bf16.msra.mxu1 %v2214_v51 }
  0xc5   :  { %1619 = vmatprep.subr.bf16.mxu1 %v2219_v52 }
  0xc6   :  { %1645 = vmatpush1.bf16.msra.mxu0 %v2241_v5 }
  0xc7   :  { %1646 = vmatprep.subr.bf16.mxu0 %v2246_v6 }
  0xc8   :  { %1620 = vmatpush2.bf16.msra.mxu1 %v2217_v54 }
  0xc9   :  { %1621 = vmatprep.subr.bf16.mxu1 %v2222_v55 }
  0xca   :  { %1647 = vmatpush1.bf16.msra.mxu0 %v2244_v7 }
  0xcb   :  { %1648 = vmatprep.subr.bf16.mxu0 %v2249_v9 }
  0xcc   :  { %1622 = vmatpush2.bf16.msra.mxu1 %v2220_v56 }
  0xcd   :  { %1623 = vmatprep.subr.bf16.mxu1 %v2225_v57 }
  0xce   :  { %1649 = vmatpush1.bf16.msra.mxu0 %v2247_v10  ;;  %v1677_v10 = vld [vmem:[%s2527_s5] sm:$0x3] }
  0xd0   :  { %1624 = vmatpush2.bf16.msra.mxu1 %v2223_v58 }
 0x111   :  { %v1078_v12 = vpop.f32.mrf.mxu0 }
 0x112   :  { %v1119_v13 = vpop.f32.mrf.mxu1  ;;  %v1079_v30 = vadd.f32 %v1078_v12, %v243_v28 }
 0x113   :  { %v1080_v14 = vpop.f32.mrf.mxu0 }
 0x114   :  { %v1121_v15 = vpop.f32.mrf.mxu1  ;;  %v1081_v31 = vadd.f32 %v1080_v14, %v247_v29  ;;  %v1120_v32 = vadd.f32 %v1119_v13, %v1079_v30  ;;  %v1686_v13 = vrot.slane %v1677_v10, %v246_v27 }
 0x115   :  { %v1082_v16 = vpop.f32.mrf.mxu0 }
 0x116   :  { %v1123_v17 = vpop.f32.mrf.mxu1  ;;  %v1122_v35 = vadd.f32 %v1121_v15, %v1081_v31  ;;  %v1682_v16 = vrot.slane %v1677_v10, %v2505_v25 }
 0x117   :  { %v1083_v18 = vpop.f32.mrf.mxu0 }
 0x118   :  { %v1124_v19 = vpop.f32.mrf.mxu1 }
 0x132   :  { %v1926_v8 = vpop.f32.mrf.mxu1 }
 0x134   :  { %v1927_v20 = vpop.f32.mrf.mxu1 }
 0x135   :  { %v1928_v50 = vadd.f32 %v1927_v20, %v1926_v8 }
 0x136   :  { %v1929_v21 = vpop.f32.mrf.mxu1 }
 0x137   :  { %v1202_v51 = vadd.f32 %v1928_v50, %v251_v49 }
 0x138   :  { %v1930_v22 = vpop.f32.mrf.mxu1 }
 0x139   :  { %v1909_v22 = vld [vmem:[#allocation2] ss:$0 sm:$0xff] }
 0x151   :  { %v1160_v33 = vpop.f32.mrf.mxu0 }
 0x152   :  { %v1948_v34 = vpop.f32.mrf.mxu1  ;;  %v1161_v36 = vadd.f32 %v1160_v33, %v1120_v32 }
 0x153   :  { %v1162_v37 = vpop.f32.mrf.mxu0 }
 0x154   :  { %v1949_v38 = vpop.f32.mrf.mxu1  ;;  %v1163_v39 = vadd.f32 %v1162_v37, %v1122_v35  ;;  %v1287_v40 = vmax.f32 %v1161_v36, 0.0 }
 0x155   :  { %v1164_v41 = vpop.f32.mrf.mxu0  ;;  %v1950_v52 = vadd.f32 %v1949_v38, %v1948_v34 }
 0x156   :  { %v1951_v42 = vpop.f32.mrf.mxu1  ;;  %v1288_v43 = vmax.f32 %v1163_v39, 0.0  ;;  %v1290_v47 = vpack.c.bf16 %v1287_v40, %v1287_v40 }
 0x157   :  { %v1165_v44 = vpop.f32.mrf.mxu0  ;;  %v1242_v56 = vadd.f32 %v1950_v52, %v1202_v51 }
 0x158   :  { %v1952_v45 = vpop.f32.mrf.mxu1  ;;  %v1291_v46 = vpack.c.bf16 %v1288_v43, %v1288_v43 }
 0x15a   :  { %1625 = vmatprep.mubr.bf16.mxu1 %v1291_v46 }
 0x15b   :  { %1626 = vmatmul.mubr.bf16.vlgmr.msra.gmra.mxu1 %v1290_v47 }
 0x171   :  { %v1970_v54 = vpop.f32.mrf.mxu0 }
 0x173   :  { %v1971_v55 = vpop.f32.mrf.mxu0 }
 0x174   :  { %v1972_v57 = vadd.f32 %v1971_v55, %v1970_v54 }
 0x175   :  { %v1973_v58 = vpop.f32.mrf.mxu0 }
 0x176   :  { %v1282_v59 = vadd.f32 %v1972_v57, %v1242_v56 }
 0x177   :  { %v1974_v60 = vpop.f32.mrf.mxu0 }
 0x178   :  { %v1289_v61 = vmax.f32 %v1282_v59, 0.0 }
 0x17a   :  { %v1292_v53 = vpack.c.bf16 %v1289_v61, %v1289_v61 }
 0x17c   :  { %1667 = vmatmul.mubr.bf16.vlgmr.msra.gmra.mxu0 %v1292_v53 }
 0x21b   :  { %v1627_v62 = vpop.f32.mrf.mxu1 }
 0x21c   :  { %v1628_v5 = vadd.f32 %v1627_v62, %v1346_v3 }
 0x21d   :  { %v1629_v63 = vpop.f32.mrf.mxu1 }
 0x21e   :  { %v1630_v7 = vadd.f32 %v1629_v63, %v1350_v4 }
 0x21f   :  { %v1631_v0 = vpop.f32.mrf.mxu1 }
 0x221   :  { %v1632_v1 = vpop.f32.mrf.mxu1 }
 0x23c   :  { %v1668_v6 = vpop.f32.mrf.mxu0 }
 0x23d   :  { %v1669_v9 = vadd.f32 %v1668_v6, %v1628_v5 }
 0x23e   :  { %v1670_v11 = vpop.f32.mrf.mxu0 }
 0x23f   :  { %v1671_v12 = vadd.f32 %v1670_v11, %v1630_v7  ;;  %v1675_v14 = vmax.f32 %v1669_v9, 0.0 }
 0x240   :  { %v1672_v15 = vpop.f32.mrf.mxu0 }
 0x241   :  { %v1676_v17 = vmax.f32 %v1671_v12, 0.0  ;;  %v1689_v8 = vmul.f32 %v1682_v16, %v1675_v14 }
 0x242   :  { %v1673_v18 = vpop.f32.mrf.mxu0 }
 0x243   :  { %v1690_v19 = vmul.f32 %v1686_v13, %v1676_v17 }
 0x245   :  { %v1692_v20 = vsel %vm1691_vm0, %v1690_v19, 0.0 }
 0x246   :  { %v1693_v21 = vadd.f32 %v1692_v20, %v1689_v8 }
 0x248   :  { %1694 = vadd.xlane.f32.xlu0 %v1693_v21 }
 0x2d1   :  { %v1695_v23 = vpop.xlane.xlu0 %1694 }
 0x2d2   :  { %v1703_v24 = vadd.f32 %v1909_v22, %v1695_v23 }
 0x2d4   :  { %1705 = vst.msk [vmem:[%s2529_s7] sm:$0xff] %vm1704_vm1, %v1703_v24 }
 0x2d5   :  { %1710 = vsyncpa [#allocation4], 1 }

</bundles_post_ra>
